<compile_context>
chip_gen: v7x
topology: tpu7x:2x2x1
jax: 0.10.0
libtpu: 0.0.40
codegen_flags: <defaults>
</compile_context>

<pallas_src>
import functools
import math

import jax
import jax.numpy as jnp
from jax.experimental import pallas as pl
from jax.experimental.pallas import tpu as pltpu

_LANE = 128      # lane width (last dim of a vreg tile)
_SUBLANE = 16    # row-padding granularity (covers f32 (8) and bf16 (16) sublane tiling)


def _round_up(n, m):
    return (n + m - 1) // m * m


def _ffn_kernel(x_ref, w1_ref, b1_ref, w2_ref, b2_ref, o_ref, acc_ref):
    # x_ref:   (TM, Dp)   native activation dtype (cast to compute dtype in-kernel)
    # w1_ref:  (Dp, TK)   compute dtype (bf16), hidden slice k
    # b1_ref:  (1,  TK)   f32, hidden slice k
    # w2_ref:  (TK, Dp)   compute dtype (bf16), hidden slice k
    # b2_ref:  (1,  Dp)   f32 (constant across the grid)
    # o_ref:   (TM, Dp)   output dtype
    # acc_ref: (TM, Dp)   f32 accumulator over hidden slices
    k = pl.program_id(1)

    @pl.when(k == 0)
    def _():
        acc_ref[...] = jnp.zeros_like(acc_ref)

    x = x_ref[...].astype(w1_ref.dtype)          # in-kernel cast: no extra HBM pass
    h = jnp.dot(x, w1_ref[...], preferred_element_type=jnp.float32)
    h = jnp.maximum(h + b1_ref[...], 0.0)        # bias + ReLU per hidden slice (exact)
    # TODO(synk): dropout omitted (eval-mode semantics; the reference line
    # `x.self.dropout(x)` is a no-op/bug in the original module anyway).
    acc_ref[...] += jnp.dot(h.astype(w2_ref.dtype), w2_ref[...],
                            preferred_element_type=jnp.float32)

    @pl.when(k == pl.num_programs(1) - 1)
    def _():
        o_ref[...] = (acc_ref[...] + b2_ref[...]).astype(o_ref.dtype)


def prepare_ffn_params(w1, b1, w2, b2, *, compute_dtype=jnp.bfloat16):
    """One-time parameter prep (NOT per forward): transpose torch-layout weights to
    (in, out), zero-pad feature dims to lane multiples, cast weights to the MXU
    compute dtype, keep biases f32.
    w1: (hidden, d_model), b1: (hidden,), w2: (d_model, hidden), b2: (d_model,)."""
    hidden, d_model = w1.shape
    dp = _round_up(d_model, _LANE)
    hp = _round_up(hidden, _LANE)
    w1_t = jnp.zeros((dp, hp), compute_dtype).at[:d_model, :hidden].set(
        w1.T.astype(compute_dtype))
    w2_t = jnp.zeros((hp, dp), compute_dtype).at[:hidden, :d_model].set(
        w2.T.astype(compute_dtype))
    b1_p = jnp.zeros((1, hp), jnp.float32).at[0, :hidden].set(b1.astype(jnp.float32))
    b2_p = jnp.zeros((1, dp), jnp.float32).at[0, :d_model].set(b2.astype(jnp.float32))
    return w1_t, b1_p, w2_t, b2_p


def _pick_tm(rows, tm_max):
    """Adaptive row tile: don't pad tiny batches to 256, and aim for >= 2 row
    tiles so both v7x TensorCores get work under dimension_semantics='parallel'."""
    rows_su = _round_up(max(rows, 1), _SUBLANE)
    if rows_su < 2 * _SUBLANE:
        return rows_su
    return max(_SUBLANE, min(tm_max, _round_up(pl.cdiv(rows_su, 2), _SUBLANE)))


def _pick_tk(hp, dp, itemsize, budget_bytes):
    """hp (weights resident, single-buffered) if W1+W2 fit the budget; otherwise the
    largest hidden slice (multiple of 128 dividing hp) whose streamed,
    double-buffered W1/W2 slices fit."""
    if 2 * dp * hp * itemsize <= budget_bytes:
        return hp
    units = hp // _LANE
    for div in range(units, 0, -1):
        if units % div:
            continue
        tk = div * _LANE
        if tk != hp and 2 * (2 * dp * tk * itemsize) <= budget_bytes:
            return tk
    return _LANE


@functools.partial(jax.jit, static_argnames=("tm_max", "tk_h", "out_dtype"))
def positionwise_feed_forward(x, w1_t, b1_p, w2_t, b2_p, *,
                              tm_max=512, tk_h=None, out_dtype=None):
    """Fused positionwise FFN.  x: [..., d_model] (native dtype, cast in-kernel).
    w1_t: (Dp, Hp), b1_p: (1, Hp), w2_t: (Hp, Dp), b2_p: (1, Dp) from
    prepare_ffn_params.  out_dtype=jnp.bfloat16 halves store bytes when the
    consumer accepts bf16."""
    *lead, d_model = x.shape
    dp, hp = w1_t.shape
    rows = math.prod(lead) if lead else 1
    out_dt = jnp.dtype(x.dtype if out_dtype is None else out_dtype)

    tm = _pick_tm(rows, tm_max)
    rows_p = _round_up(max(rows, 1), tm)

    comp_sz = jnp.dtype(w1_t.dtype).itemsize
    if tk_h is None:
        tk_h = _pick_tk(hp, dp, comp_sz, budget_bytes=24 << 20)
    assert hp % tk_h == 0 and tk_h % _LANE == 0, (hp, tk_h)
    n_k = hp // tk_h
    resident = n_k == 1

    # Fast path: zero-copy reshape when rows/features already line up
    # (the normal production case: rows % tm == 0 and d_model % 128 == 0).
    x2 = x.reshape(rows, d_model)
    if rows_p != rows or dp != d_model:
        x2 = jnp.pad(x2, ((0, rows_p - rows), (0, dp - d_model)))

    grid = (rows_p // tm, n_k)

    def _wspec(shape, index_map):
        # Constant (resident) blocks get a single pipeline buffer; streamed
        # slices keep the default double buffer so their DMA stays hidden.
        if resident:
            return pl.BlockSpec(shape, index_map, pipeline_mode=pl.Buffered(1))
        return pl.BlockSpec(shape, index_map)

    in_specs = [
        pl.BlockSpec((tm, dp), lambda i, k: (i, 0)),        # x row tile (resident across k)
        _wspec((dp, tk_h), lambda i, k: (0, k)),            # W1 hidden slice
        _wspec((1, tk_h), lambda i, k: (0, k)),             # b1 hidden slice
        _wspec((tk_h, dp), lambda i, k: (k, 0)),            # W2 hidden slice
        _wspec((1, dp), lambda i, k: (0, 0)),               # b2 (always constant)
    ]
    out_spec = pl.BlockSpec((tm, dp), lambda i, k: (i, 0))

    # VMEM budget: actual buffers + headroom, capped at 48 MiB (v7x safe).
    x_sz = jnp.dtype(x2.dtype).itemsize
    o_sz = out_dt.itemsize
    n_wbuf = 1 if resident else 2
    vmem_bytes = (
        2 * tm * dp * x_sz                               # x tile, double-buffered
        + 2 * tm * dp * o_sz                             # out tile, double-buffered
        + n_wbuf * (dp * tk_h + tk_h * dp) * comp_sz     # W1/W2 slice buffers
        + n_wbuf * tk_h * 4 + dp * 4                     # biases (f32)
        + tm * dp * 4                                    # f32 accumulator scratch
        + 2 * tm * tk_h * 4                              # f32 hidden intermediate + cast copy
    )
    vmem_limit = int(min(48 << 20, max(vmem_bytes * 3 // 2 + (2 << 20), 32 << 20)))

    flops = 2 * rows_p * dp * hp * 2                     # two matmuls
    bytes_accessed = int(rows_p * dp * x_sz              # single pass over activations
                         + (dp * hp + hp * dp) * comp_sz
                         + (hp + dp) * 4
                         + rows_p * dp * o_sz)

    out = pl.pallas_call(
        _ffn_kernel,
        out_shape=jax.ShapeDtypeStruct((rows_p, dp), out_dt),
        grid_spec=pltpu.PrefetchScalarGridSpec(
            num_scalar_prefetch=0,
            grid=grid,
            in_specs=in_specs,
            out_specs=out_spec,
            scratch_shapes=[pltpu.VMEM((tm, dp), jnp.float32)],
        ),
        compiler_params=pltpu.CompilerParams(
            dimension_semantics=("parallel", "arbitrary"),   # rows across TCs, hidden serial
            vmem_limit_bytes=vmem_limit,
        ),
        cost_estimate=pl.CostEstimate(
            flops=flops, transcendentals=0, bytes_accessed=bytes_accessed),
    )(x2, w1_t, b1_p, w2_t, b2_p)

    return out[:rows, :d_model].reshape(*lead, d_model)


def _torch_linear_init(key, fan_out, fan_in):
    """Deterministic init matching nn.Linear's kaiming-uniform scheme."""
    kw, kb = jax.random.split(key)
    bound = 1.0 / math.sqrt(fan_in)
    w = jax.random.uniform(kw, (fan_out, fan_in), jnp.float32, minval=-bound, maxval=bound)
    b = jax.random.uniform(kb, (fan_out,), jnp.float32, minval=-bound, maxval=bound)
    return w, b


def _bf16_reference(x, w1, b1, w2, b2):
    """Pure-JAX reference with identical numerics (bf16 operands, f32 accumulation)."""
    bf16 = jnp.bfloat16
    h = jnp.maximum(
        jnp.dot(x.astype(bf16), w1.T.astype(bf16),
                preferred_element_type=jnp.float32) + b1, 0.0)
    return (jnp.dot(h.astype(bf16), w2.T.astype(bf16),
                    preferred_element_type=jnp.float32) + b2).astype(x.dtype)


if __name__ == "__main__":
    key = jax.random.PRNGKey(0)

    # --- Check 1: module-sized demo shapes (d_model=16, hidden=32, B=2, S=8) ---
    d_model, hidden = 16, 32
    B, S = 2, 8
    kx, k1, k2, key = jax.random.split(key, 4)
    x = jax.random.normal(kx, (B, S, d_model), jnp.float32)
    w1, b1 = _torch_linear_init(k1, hidden, d_model)     # fc1: d_model -> hidden
    w2, b2 = _torch_linear_init(k2, d_model, hidden)     # fc2: hidden -> d_model

    params = prepare_ffn_params(w1, b1, w2, b2)          # one-time transpose/pad/cast
    out = jax.block_until_ready(positionwise_feed_forward(x, *params))
    assert out.shape == (B, S, d_model)

    ref = _bf16_reference(x, w1, b1, w2, b2)
    assert jnp.allclose(out, ref, atol=1e-3, rtol=1e-3), \
        float(jnp.max(jnp.abs(out - ref)))
    ref_f32 = jnp.maximum(x @ w1.T + b1, 0.0) @ w2.T + b2
    assert jnp.allclose(out, ref_f32, atol=5e-2, rtol=5e-2)

    # --- Check 2: exercise the hidden-dim split (2 k-steps), multiple row tiles,
    #              the no-pad fast path, and the bf16 output option. ---
    d_model2, hidden2 = 256, 256
    B2, S2 = 4, 48
    kx2, k3, k4, key = jax.random.split(key, 4)
    x_big = jax.random.normal(kx2, (B2, S2, d_model2), jnp.float32)
    w1b, b1b = _torch_linear_init(k3, hidden2, d_model2)
    w2b, b2b = _torch_linear_init(k4, d_model2, hidden2)

    params2 = prepare_ffn_params(w1b, b1b, w2b, b2b)
    out2 = jax.block_until_ready(
        positionwise_feed_forward(x_big, *params2, tk_h=128, out_dtype=jnp.bfloat16))
    assert out2.dtype == jnp.bfloat16 and out2.shape == (B2, S2, d_model2)
    ref2 = _bf16_reference(x_big, w1b, b1b, w2b, b2b)
    diff = jnp.abs(out2.astype(jnp.float32) - ref2.astype(jnp.float32))
    assert jnp.allclose(out2.astype(jnp.float32), ref2.astype(jnp.float32),
                        atol=3e-2, rtol=3e-2), float(jnp.max(diff))

    print("KERNEL_OK")
</pallas_src>

<mosaic_0001>
module attributes {stable_mosaic.version = 11 : i64} {
  func.func @_ffn_kernel(%arg0: i32, %arg1: i32, %arg2: memref<16x128xf32, #tpu.memory_space<vmem>>, %arg3: memref<128x128xbf16, #tpu.memory_space<vmem>>, %arg4: memref<1x128xf32, #tpu.memory_space<vmem>>, %arg5: memref<128x128xbf16, #tpu.memory_space<vmem>>, %arg6: memref<1x128xf32, #tpu.memory_space<vmem>>, %arg7: memref<16x128xf32, #tpu.memory_space<vmem>>, %arg8: memref<16x128xf32, #tpu.memory_space<vmem>>) attributes {dimension_semantics = [#tpu.dimension_semantics<parallel>, #tpu.dimension_semantics<arbitrary>], iteration_bounds = array<i64: 1, 1>, scalar_prefetch = 0 : i64, scratch_operands = 1 : i64, tpu.core_type = #tpu.core_type<tc>, window_params = [{transform_indices = @transform_0, window_bounds = array<i64: 16, 128>}, {pipeline_mode = #tpu.pipeline_mode<synchronous>, transform_indices = @transform_1, window_bounds = array<i64: 128, 128>}, {pipeline_mode = #tpu.pipeline_mode<synchronous>, transform_indices = @transform_2, window_bounds = array<i64: 1, 128>}, {pipeline_mode = #tpu.pipeline_mode<synchronous>, transform_indices = @transform_3, window_bounds = array<i64: 128, 128>}, {pipeline_mode = #tpu.pipeline_mode<synchronous>, transform_indices = @transform_4, window_bounds = array<i64: 1, 128>}, {transform_indices = @transform_5, window_bounds = array<i64: 16, 128>}]} {
    %c0_i32 = arith.constant 0 : i32
    %0 = arith.cmpi eq, %arg1, %c0_i32 : i32
    %1 = arith.extui %0 : i1 to i32
    %c0_i32_0 = arith.constant 0 : i32
    %2 = arith.cmpi ne, %1, %c0_i32_0 : i32
    scf.if %2 {
      %cst_16 = arith.constant 0.000000e+00 : f32
      %21 = vector.broadcast %cst_16 : f32 to vector<16x128xf32>
      %c0_17 = arith.constant 0 : index
      %c0_18 = arith.constant 0 : index
      %22 = vector.load %arg8[%c0_17, %c0_18] : memref<16x128xf32, #tpu.memory_space<vmem>>, vector<16x128xf32>
      tpu.vector_store %arg8[%c0_17, %c0_18], %21 {strides = array<i32>} : memref<16x128xf32, #tpu.memory_space<vmem>>, vector<16x128xf32>,
    } else {
    }
    %c0 = arith.constant 0 : index
    %c0_1 = arith.constant 0 : index
    %3 = vector.load %arg2[%c0, %c0_1] : memref<16x128xf32, #tpu.memory_space<vmem>>, vector<16x128xf32>
    %4 = arith.truncf %3 : vector<16x128xf32> to vector<16x128xbf16>
    %c0_2 = arith.constant 0 : index
    %c0_3 = arith.constant 0 : index
    %5 = vector.load %arg3[%c0_2, %c0_3] : memref<128x128xbf16, #tpu.memory_space<vmem>>, vector<128x128xbf16>
    %cst = arith.constant dense<0.000000e+00> : vector<16x128xf32>
    %6 = tpu.matmul %4, %5, %cst {dimension_numbers = #tpu.dot_dimension_numbers<[1], [0], [0], [1], [0, 0, 1, 1], [], []>} : vector<16x128xbf16>, vector<128x128xbf16>, vector<16x128xf32> -> vector<16x128xf32>
    %c0_4 = arith.constant 0 : index
    %c0_5 = arith.constant 0 : index
    %7 = vector.load %arg4[%c0_4, %c0_5] : memref<1x128xf32, #tpu.memory_space<vmem>>, vector<1x128xf32>
    %8 = vector.broadcast %7 : vector<1x128xf32> to vector<16x128xf32>
    %9 = arith.addf %6, %8 : vector<16x128xf32>
    %cst_6 = arith.constant 0.000000e+00 : f32
    %10 = vector.broadcast %cst_6 : f32 to vector<16x128xf32>
    %11 = arith.maximumf %9, %10 : vector<16x128xf32>
    %c0_7 = arith.constant 0 : index
    %c0_8 = arith.constant 0 : index
    %12 = vector.load %arg8[%c0_7, %c0_8] : memref<16x128xf32, #tpu.memory_space<vmem>>, vector<16x128xf32>
    %13 = arith.truncf %11 : vector<16x128xf32> to vector<16x128xbf16>
    %c0_9 = arith.constant 0 : index
    %c0_10 = arith.constant 0 : index
    %14 = vector.load %arg5[%c0_9, %c0_10] : memref<128x128xbf16, #tpu.memory_space<vmem>>, vector<128x128xbf16>
    %cst_11 = arith.constant dense<0.000000e+00> : vector<16x128xf32>
    %15 = tpu.matmul %13, %14, %cst_11 {dimension_numbers = #tpu.dot_dimension_numbers<[1], [0], [0], [1], [0, 0, 1, 1], [], []>} : vector<16x128xbf16>, vector<128x128xbf16>, vector<16x128xf32> -> vector<16x128xf32>
    %16 = arith.addf %12, %15 : vector<16x128xf32>
    %c0_12 = arith.constant 0 : index
    %c0_13 = arith.constant 0 : index
    %17 = vector.load %arg8[%c0_12, %c0_13] : memref<16x128xf32, #tpu.memory_space<vmem>>, vector<16x128xf32>
    tpu.vector_store %arg8[%c0_12, %c0_13], %16 {strides = array<i32>} : memref<16x128xf32, #tpu.memory_space<vmem>>, vector<16x128xf32>,
    %c0_i32_14 = arith.constant 0 : i32
    %18 = arith.cmpi eq, %arg1, %c0_i32_14 : i32
    %19 = arith.extui %18 : i1 to i32
    %c0_i32_15 = arith.constant 0 : i32
    %20 = arith.cmpi ne, %19, %c0_i32_15 : i32
    scf.if %20 {
      %c0_16 = arith.constant 0 : index
      %c0_17 = arith.constant 0 : index
      %21 = vector.load %arg8[%c0_16, %c0_17] : memref<16x128xf32, #tpu.memory_space<vmem>>, vector<16x128xf32>
      %c0_18 = arith.constant 0 : index
      %c0_19 = arith.constant 0 : index
      %22 = vector.load %arg6[%c0_18, %c0_19] : memref<1x128xf32, #tpu.memory_space<vmem>>, vector<1x128xf32>
      %23 = vector.broadcast %22 : vector<1x128xf32> to vector<16x128xf32>
      %24 = arith.addf %21, %23 : vector<16x128xf32>
      %c0_20 = arith.constant 0 : index
      %c0_21 = arith.constant 0 : index
      %25 = vector.load %arg7[%c0_20, %c0_21] : memref<16x128xf32, #tpu.memory_space<vmem>>, vector<16x128xf32>
      tpu.vector_store %arg7[%c0_20, %c0_21], %24 {strides = array<i32>} : memref<16x128xf32, #tpu.memory_space<vmem>>, vector<16x128xf32>,
    } else {
    }
    return
  }
  func.func @transform_0(%arg0: i32, %arg1: i32) -> (i32, i32) {
    %c0_i32 = arith.constant 0 : i32
    %c0_i32_0 = arith.constant 0 : i32
    return %arg0, %c0_i32 : i32, i32
  }
  func.func @transform_1(%arg0: i32, %arg1: i32) -> (i32, i32) {
    %c0_i32 = arith.constant 0 : i32
    %c0_i32_0 = arith.constant 0 : i32
    return %c0_i32, %arg1 : i32, i32
  }
  func.func @transform_2(%arg0: i32, %arg1: i32) -> (i32, i32) {
    %c0_i32 = arith.constant 0 : i32
    %c0_i32_0 = arith.constant 0 : i32
    return %c0_i32, %arg1 : i32, i32
  }
  func.func @transform_3(%arg0: i32, %arg1: i32) -> (i32, i32) {
    %c0_i32 = arith.constant 0 : i32
    %c0_i32_0 = arith.constant 0 : i32
    return %arg1, %c0_i32 : i32, i32
  }
  func.func @transform_4(%arg0: i32, %arg1: i32) -> (i32, i32) {
    %c0_i32 = arith.constant 0 : i32
    %c0_i32_0 = arith.constant 0 : i32
    %c0_i32_1 = arith.constant 0 : i32
    return %c0_i32, %c0_i32_0 : i32, i32
  }
  func.func @transform_5(%arg0: i32, %arg1: i32) -> (i32, i32) {
    %c0_i32 = arith.constant 0 : i32
    %c0_i32_0 = arith.constant 0 : i32
    return %arg0, %c0_i32 : i32, i32
  }
}

</mosaic_0001>

<bundles_post_ra>
// kernel: positionwise_feed_forward.1
= control target key start
LH: loop header
LB: loop body
LE: loop exit
PB: predicated region body
PF: predicated region fallthrough
CT: control target
= control target key end

     0   :  { %10 = vsyncpa [#allocation4], 0  ;;  %s530_s0 = inlined_call_operand.vmem [shape: f32[16,128], index: 0, kind: input, shape index: {}]   ;;  %s531_s1 = inlined_call_operand.hbm [shape: bf16[128,128], index: 1, kind: input, shape index: {}]   ;;  %s532_s2 = inlined_call_operand.vmem [shape: f32[1,128], index: 2, kind: input, shape index: {}]   ;;  %s533_s3 = inlined_call_operand.hbm [shape: bf16[128,128], index: 3, kind: input, shape index: {}]   ;;  %s534_s4 = inlined_call_operand.vmem [shape: f32[1,128], index: 4, kind: input, shape index: {}]   ;;  %s535_s5 = inlined_call_operand.vmem [shape: f32[16,128], index: 5, kind: output, shape index: {}]  }
   0x1   :  { %11 = vsyncpa [#allocation6], 0  ;;  %s452_s18 = smov [#allocation3]   ;;  %s404_s22 = scalar_lea.hbm %s531_s1, 1024 }
   0x2   :  { %s19_s19 = sshll.u32 %s452_s18, 4  ;;  %p405_p0 = scmp.ne.s32.totalorder %s531_s1, %s404_s22  ;;  %s20_s19 = int_to_ptr.vmem [resolvable:$true] %s19_s19 }
   0x3   :  { %p408_p1 = scmp.lt.u32.totalorder %s404_s22, %s531_s1 }
   0x5   :  { %p410_p2 = pnand %p408_p1, %p405_p0 }
   0x7   :  { %413 = shalt.err (!%p410_p2)
}
   0x8   :  { %s414_s27 = scalar_lea.vmem %s20_s19, 1024  ;;  %p419_p4 = scmp.lt.s32.totalorder %s20_s19, %s20_s19 }
   0x9   :  { %p415_p3 = scmp.ne.s32.totalorder %s20_s19, %s414_s27  ;;  %p420_p5 = scmp.lt.s32.totalorder %s414_s27, %s414_s27 }
   0xb   :  { %p421_p6 = por %p420_p5, %p419_p4 }
   0xd   :  { %p422_p7 = pnand %p421_p6, %p415_p3 }
   0xf   :  { %425 = shalt.err (!%p422_p7)
}
  0x10   :  { %s453_s28 = smov 64   ;;  %s454_s29 = smov 4  }
  0x11   :  { %25 = dma.hbm_to_vmem [thread:$0]  %s531_s1, 1024, %s20_s19, [#allocation4], %s453_s28, %s453_s28, %s454_s29  }
  0x12   :  { %s455_s7 = smov [#allocation5]   ;;  %s426_s11 = scalar_lea.hbm %s533_s3, 1024 }
  0x13   :  { %s33_s8 = sshll.u32 %s455_s7, 4  ;;  %p427_p8 = scmp.ne.s32.totalorder %s533_s3, %s426_s11  ;;  %s34_s8 = int_to_ptr.vmem [resolvable:$true] %s33_s8 }
  0x14   :  { %p430_p9 = scmp.lt.u32.totalorder %s426_s11, %s533_s3 }
  0x16   :  { %p432_p10 = pnand %p430_p9, %p427_p8 }
  0x18   :  { %435 = shalt.err (!%p432_p10)
}
  0x19   :  { %s436_s16 = scalar_lea.vmem %s34_s8, 1024  ;;  %p441_p12 = scmp.lt.s32.totalorder %s34_s8, %s34_s8 }
  0x1a   :  { %p437_p11 = scmp.ne.s32.totalorder %s34_s8, %s436_s16  ;;  %p442_p13 = scmp.lt.s32.totalorder %s436_s16, %s436_s16 }
  0x1c   :  { %p443_p0 = por %p442_p13, %p441_p12 }
  0x1e   :  { %p444_p1 = pnand %p443_p0, %p437_p11 }
  0x20   :  { %447 = shalt.err (!%p444_p1)
}
  0x21   :  { %39 = dma.hbm_to_vmem [thread:$0]  %s533_s3, 1024, %s34_s8, [#allocation6], %s453_s28, %s453_s28, %s454_s29  }
  0x22   :  { %448 = dma.done.wait [#allocation4], 1024  }
  0x23   :  { %449 = vsyncadd [#allocation4], 4294966272 }
  0x24   :  { %450 = dma.done.wait [#allocation6], 1024  }
  0x25   :  { %451 = vsyncadd [#allocation6], 4294966272  ;;  %v456_v0 = vmov 0.0   ;;  %vm457_vm0 = vmmov 0   ;;  %v388_v1 = vld [vmem:[#allocation3] sm:$0xff]   ;;  %v389_v2 = vld [vmem:[#allocation3 + $0x8] sm:$0xff]  }
  0x26   :  { %342 = vmatprep.subr.bf16.mxu0 %v456_v0  ;;  %358 = vmatprep.mubr.msk.bf16.mxu0 %vm457_vm0, %v456_v0  ;;  %v390_v3 = vld [vmem:[#allocation3 + $0x10] sm:$0xff]   ;;  %v396_v4 = vld [vmem:[#allocation5] sm:$0xff]   ;;  %v391_v5 = vld [vmem:[#allocation3 + $0x18] sm:$0xff]  }
  0x27   :  { %362 = vmatprep.subr.bf16.mxu1 %v456_v0  ;;  %378 = vmatprep.mubr.msk.bf16.mxu1 %vm457_vm0, %v456_v0  ;;  %v397_v6 = vld [vmem:[#allocation5 + $0x8] sm:$0xff]   ;;  %v392_v7 = vld [vmem:[#allocation3 + $0x20] sm:$0xff]   ;;  %v398_v8 = vld [vmem:[#allocation5 + $0x10] sm:$0xff]  }
  0x28   :  { %343 = vmatpush3.bf16.msra.mxu0 %v388_v1  ;;  %363 = vmatpush3.bf16.msra.mxu1 %v396_v4  ;;  %v393_v9 = vld [vmem:[#allocation3 + $0x28] sm:$0xff]   ;;  %v399_v10 = vld [vmem:[#allocation5 + $0x18] sm:$0xff]   ;;  %v394_v11 = vld [vmem:[#allocation3 + $0x30] sm:$0xff]  }
  0x29   :  { %344 = vmatprep.subr.bf16.mxu0 %v456_v0  ;;  %364 = vmatprep.subr.bf16.mxu1 %v456_v0  ;;  %v400_v12 = vld [vmem:[#allocation5 + $0x20] sm:$0xff]   ;;  %v395_v13 = vld [vmem:[#allocation3 + $0x38] sm:$0xff]   ;;  %v56_v15 = vld [vmem:[%s530_s0 + $0x8] sm:$0xff] }
  0x2a   :  { %v55_v14 = vld [vmem:[%s530_s0] sm:$0xff]  ;;  %v401_v16 = vld [vmem:[#allocation5 + $0x28] sm:$0xff]   ;;  %v402_v18 = vld [vmem:[#allocation5 + $0x30] sm:$0xff]  }
  0x2b   :  { %v57_v17 = vpack.c.bf16 %v56_v15, %v55_v14  ;;  %v403_v19 = vld [vmem:[#allocation5 + $0x38] sm:$0xff]   ;;  %v306_v20 = vld [vmem:[%s532_s2] ss:$0 sm:$0xff] }
  0x2c   :  { %345 = vmatpush3.bf16.msra.mxu0 %v389_v2  ;;  %365 = vmatpush3.bf16.msra.mxu1 %v397_v6  ;;  %v323_v30 = vld [vmem:[%s534_s4] ss:$0 sm:$0xff] }
  0x2d   :  { %346 = vmatprep.subr.bf16.mxu0 %v456_v0  ;;  %366 = vmatprep.subr.bf16.mxu1 %v456_v0 }
  0x30   :  { %347 = vmatpush3.bf16.msra.mxu0 %v390_v3  ;;  %367 = vmatpush3.bf16.msra.mxu1 %v398_v8 }
  0x31   :  { %348 = vmatprep.subr.bf16.mxu0 %v456_v0  ;;  %368 = vmatprep.subr.bf16.mxu1 %v456_v0 }
  0x34   :  { %349 = vmatpush3.bf16.msra.mxu0 %v391_v5  ;;  %369 = vmatpush3.bf16.msra.mxu1 %v399_v10 }
  0x35   :  { %350 = vmatprep.subr.bf16.mxu0 %v456_v0  ;;  %370 = vmatprep.subr.bf16.mxu1 %v456_v0 }
  0x38   :  { %351 = vmatpush3.bf16.msra.mxu0 %v392_v7  ;;  %371 = vmatpush3.bf16.msra.mxu1 %v400_v12 }
  0x39   :  { %352 = vmatprep.subr.bf16.mxu0 %v456_v0  ;;  %372 = vmatprep.subr.bf16.mxu1 %v456_v0 }
  0x3c   :  { %353 = vmatpush3.bf16.msra.mxu0 %v393_v9  ;;  %373 = vmatpush3.bf16.msra.mxu1 %v401_v16 }
  0x3d   :  { %354 = vmatprep.subr.bf16.mxu0 %v456_v0  ;;  %374 = vmatprep.subr.bf16.mxu1 %v456_v0 }
  0x40   :  { %355 = vmatpush3.bf16.msra.mxu0 %v394_v11  ;;  %375 = vmatpush3.bf16.msra.mxu1 %v402_v18 }
  0x41   :  { %356 = vmatprep.subr.bf16.mxu0 %v456_v0  ;;  %376 = vmatprep.subr.bf16.mxu1 %v456_v0 }
  0x44   :  { %357 = vmatpush3.bf16.msra.mxu0 %v395_v13  ;;  %377 = vmatpush3.bf16.msra.mxu1 %v403_v19 }
  0x47   :  { %359 = vmatmul.mubr.bf16.vlgmr.msra.gmra.mrb[0].mxu0 %v57_v17 }
 0x11a   :  { %v163_v21 = vpop.f32.mrb[0].mxu0 }
 0x11b   :  { %v164_v22 = vadd.f32 %v306_v20, %v163_v21  ;;  %v360_v23 = vpop.f32.mrb[1].mxu0 }
 0x11c   :  { %v166_v24 = vpop.f32.mrb[2].mxu0 }
 0x11d   :  { %v167_v25 = vadd.f32 %v306_v20, %v166_v24  ;;  %v361_v26 = vpop.f32.mrb[3].mxu0  ;;  %v170_v27 = vmax.f32 %v164_v22, 0.0 }
 0x11f   :  { %v171_v28 = vmax.f32 %v167_v25, 0.0 }
 0x121   :  { %v174_v29 = vpack.c.bf16 %v171_v28, %v170_v27 }
 0x123   :  { %379 = vmatmul.mubr.bf16.vlgmr.msra.gmra.mrb[0].mxu1 %v174_v29 }
 0x1f6   :  { %v273_v31 = vpop.f32.mrb[0].mxu1 }
 0x1f7   :  { %v296_v32 = vadd.f32 %v323_v30, %v273_v31  ;;  %v380_v33 = vpop.f32.mrb[1].mxu1 }
 0x1f8   :  { %v276_v34 = vpop.f32.mrb[2].mxu1 }
 0x1f9   :  { %298 = vst [vmem:[%s535_s5] sm:$0xff] %v296_v32  ;;  %v297_v35 = vadd.f32 %v323_v30, %v276_v34  ;;  %v381_v36 = vpop.f32.mrb[3].mxu1 }
 0x1fb   :  { %299 = vst [vmem:[%s535_s5 + $0x8] sm:$0xff] %v297_v35 }
 0x1fc   :  { %304 = vsyncpa [#allocation4], 1 }
 0x1fd   :  { %305 = vsyncpa [#allocation6], 1 }

</bundles_post_ra>
